<compile_context>
chip_gen: v5e
topology: v5e:2x2
jax: 0.10.0
libtpu: 0.0.40
codegen_flags: <defaults>
</compile_context>

<pallas_src>
import functools

import jax
import jax.numpy as jnp
from jax.experimental import pallas as pl
from jax.experimental.pallas import tpu as pltpu

IGNORE_INDEX = 255


def _ce_kernel(logits_ref, labels_ref, sum_ref, cnt_ref, sum_acc, cnt_acc,
               *, tl, nbh, m_rows):
    p = pl.program_id(0)          # core-split axis ("parallel")
    i = pl.program_id(1)          # column-block axis ("arbitrary", reduction)

    @pl.when(i == 0)
    def _():
        sum_acc[...] = jnp.zeros_like(sum_acc)
        cnt_acc[...] = jnp.zeros_like(cnt_acc)

    x = logits_ref[...].astype(jnp.float32)          # (C, TL)
    lbl = labels_ref[...]                            # (1, TL) int32

    # Global column index (= row of the original (M, C) view) of each lane.
    # Masks the ragged tail block and the clamped redundant block of core 1.
    col = (p * nbh + i) * tl + jax.lax.broadcasted_iota(jnp.int32, (1, tl), 1)
    valid = (col < m_rows) & (lbl != IGNORE_INDEX)   # (1, TL) bool

    # Numerically-stable log-sum-exp over classes (sublane axis).
    mx = jnp.max(x, axis=0, keepdims=True)                              # (1, TL)
    lse = mx + jnp.log(jnp.sum(jnp.exp(x - mx), axis=0, keepdims=True))  # (1, TL)

    # logits[label] via one-hot select (no dynamic gather on TPU).
    cls = jax.lax.broadcasted_iota(jnp.int32, x.shape, 0)               # (C, TL)
    picked = jnp.sum(jnp.where(cls == lbl, x, 0.0), axis=0, keepdims=True)

    per_col = jnp.where(valid, lse - picked, 0.0)                       # (1, TL)
    sum_acc[...] += per_col                      # lane-dense accumulate
    cnt_acc[...] += valid.astype(jnp.float32)

    @pl.when(i == pl.num_programs(1) - 1)
    def _():
        sum_ref[...] = jnp.sum(sum_acc[...], axis=1, keepdims=True).reshape(1, 1, 1)
        cnt_ref[...] = jnp.sum(cnt_acc[...], axis=1, keepdims=True).reshape(1, 1, 1)


def _pick_tl(c, m):
    """Lane-tile width: ~4 MiB of logits per pipeline buffer, aligned & clamped."""
    c_pad = ((c + 7) // 8) * 8                       # sublane padding of the block
    budget = 4 * 1024 * 1024                         # bytes per logits buffer
    tl = (budget // (c_pad * 4) // 128) * 128
    tl = max(128, min(65536, tl))
    m_ru = ((m + 127) // 128) * 128
    tl = min(tl, m_ru)
    if m < 128:
        tl = m                                       # full-dim block is always legal
    return tl


@functools.partial(jax.jit, static_argnames=("tl",))
def cross_entropy_2d(out, target, tl=None):
    """Equivalent of CrossEntropy2d().forward(out, target)."""
    n, c, h, w = out.shape
    m = n * h * w
    # Exactly what the PyTorch module computes: out.view(-1, c) — a raw
    # row-major regrouping of the NCHW buffer (no permute). One transpose so
    # classes sit on the sublane axis inside the kernel (lane-dense rows).
    logits_t = out.reshape(m, c).T                   # (C, M)
    labels = target.reshape(1, m).astype(jnp.int32)  # (1, M)

    if tl is None:
        tl = _pick_tl(c, m)
    nb = (m + tl - 1) // tl                          # number of column blocks
    n_par = 2 if nb > 1 else 1                       # split across v7x's 2 TCs
    nbh = (nb + n_par - 1) // n_par                  # blocks per core

    def col_map(p, i):
        # Clamp the possibly out-of-range trailing block of the second core;
        # its contribution is fully masked in-kernel via the column index.
        return (0, jnp.minimum(p * nbh + i, nb - 1))

    kernel = functools.partial(_ce_kernel, tl=tl, nbh=nbh, m_rows=m)

    sums, cnts = pl.pallas_call(
        kernel,
        out_shape=(
            jax.ShapeDtypeStruct((n_par, 1, 1), jnp.float32),
            jax.ShapeDtypeStruct((n_par, 1, 1), jnp.float32),
        ),
        grid_spec=pltpu.PrefetchScalarGridSpec(
            num_scalar_prefetch=0,
            grid=(n_par, nbh),
            in_specs=[
                pl.BlockSpec((c, tl), col_map),      # logits, classes on sublanes
                pl.BlockSpec((1, tl), col_map),      # labels, lane-dense
            ],
            out_specs=[
                pl.BlockSpec((1, 1, 1), lambda p, i: (p, 0, 0)),
                pl.BlockSpec((1, 1, 1), lambda p, i: (p, 0, 0)),
            ],
            scratch_shapes=[
                pltpu.VMEM((1, tl), jnp.float32),    # running loss sum (lane-dense)
                pltpu.VMEM((1, tl), jnp.float32),    # running valid count
            ],
        ),
        compiler_params=pltpu.CompilerParams(
            dimension_semantics=("parallel", "arbitrary"),
            vmem_limit_bytes=48 * 1024 * 1024,
        ),
    )(logits_t, labels)

    # Mean over non-ignored elements (NaN if none valid — matches PyTorch).
    return jnp.sum(sums) / jnp.sum(cnts)


def _reference(out, target):
    """Plain-JAX reference matching the (buggy-by-design) PyTorch forward."""
    n, c, h, w = out.shape
    logits = out.reshape(-1, c).astype(jnp.float32)
    labels = target.reshape(-1).astype(jnp.int32)
    lse = jax.nn.logsumexp(logits, axis=-1)
    picked = jnp.take_along_axis(logits, labels[:, None], axis=-1)[:, 0]
    valid = labels != IGNORE_INDEX
    per_row = jnp.where(valid, lse - picked, 0.0)
    return jnp.sum(per_row) / jnp.sum(valid.astype(jnp.float32))


if __name__ == "__main__":
    key = jax.random.PRNGKey(0)
    k1, k2, k3 = jax.random.split(key, 3)

    # Small deterministic NCHW inputs (batch=2, channels=4, spatial=16).
    N, C, H, W = 2, 4, 16, 16
    out = jax.random.normal(k1, (N, C, H, W), dtype=jnp.float32)
    target = jax.random.randint(k2, (N, H, W), 0, C, dtype=jnp.int32)
    ignore_mask = jax.random.bernoulli(k3, 0.1, (N, H, W))
    target = jnp.where(ignore_mask, IGNORE_INDEX, target)

    loss = cross_entropy_2d(out, target)
    jax.block_until_ready(loss)
    ref = _reference(out, target)
    assert jnp.allclose(loss, ref, rtol=1e-5, atol=1e-5), (loss, ref)

    # Second case: forces multiple column blocks, a ragged tail block and the
    # clamped redundant block on the second ("parallel") grid half.
    N2, C2, H2, W2 = 2, 4, 16, 17            # M = 544, tl=128 -> 5 blocks, 2 halves
    k4, k5, k6 = jax.random.split(k3, 3)
    out2 = jax.random.normal(k4, (N2, C2, H2, W2), dtype=jnp.float32)
    target2 = jax.random.randint(k5, (N2, H2, W2), 0, C2, dtype=jnp.int32)
    target2 = jnp.where(jax.random.bernoulli(k6, 0.1, (N2, H2, W2)),
                        IGNORE_INDEX, target2)
    loss2 = cross_entropy_2d(out2, target2, tl=128)
    jax.block_until_ready(loss2)
    ref2 = _reference(out2, target2)
    assert jnp.allclose(loss2, ref2, rtol=1e-5, atol=1e-5), (loss2, ref2)

    print("KERNEL_OK")
</pallas_src>

<mosaic_0001>
module attributes {stable_mosaic.version = 11 : i64} {
  func.func @_ce_kernel(%arg0: i32, %arg1: i32, %arg2: memref<4x512xf32, #tpu.memory_space<vmem>>, %arg3: memref<1x512xi32, #tpu.memory_space<vmem>>, %arg4: memref<1x1x1xf32, #tpu.memory_space<vmem>>, %arg5: memref<1x1x1xf32, #tpu.memory_space<vmem>>, %arg6: memref<1x512xf32, #tpu.memory_space<vmem>>, %arg7: memref<1x512xf32, #tpu.memory_space<vmem>>) attributes {dimension_semantics = [#tpu.dimension_semantics<parallel>, #tpu.dimension_semantics<arbitrary>], iteration_bounds = array<i64: 1, 1>, scalar_prefetch = 0 : i64, scratch_operands = 2 : i64, tpu.core_type = #tpu.core_type<tc>, window_params = [{transform_indices = @transform_0, window_bounds = array<i64: 4, 512>}, {transform_indices = @transform_1, window_bounds = array<i64: 1, 512>}, {transform_indices = @transform_2, window_bounds = array<i64: 1, 1, 1>}, {transform_indices = @transform_3, window_bounds = array<i64: 1, 1, 1>}]} {
    %c0_i32 = arith.constant 0 : i32
    %0 = arith.cmpi eq, %arg1, %c0_i32 : i32
    %1 = arith.extui %0 : i1 to i32
    %c0_i32_0 = arith.constant 0 : i32
    %2 = arith.cmpi ne, %1, %c0_i32_0 : i32
    scf.if %2 {
      %cst_19 = arith.constant 0.000000e+00 : f32
      %46 = vector.broadcast %cst_19 : f32 to vector<1x512xf32>
      %c0_20 = arith.constant 0 : index
      %c0_21 = arith.constant 0 : index
      %47 = vector.load %arg6[%c0_20, %c0_21] : memref<1x512xf32, #tpu.memory_space<vmem>>, vector<1x512xf32>
      tpu.vector_store %arg6[%c0_20, %c0_21], %46 {strides = array<i32>} : memref<1x512xf32, #tpu.memory_space<vmem>>, vector<1x512xf32>,
      %cst_22 = arith.constant 0.000000e+00 : f32
      %48 = vector.broadcast %cst_22 : f32 to vector<1x512xf32>
      %c0_23 = arith.constant 0 : index
      %c0_24 = arith.constant 0 : index
      %49 = vector.load %arg7[%c0_23, %c0_24] : memref<1x512xf32, #tpu.memory_space<vmem>>, vector<1x512xf32>
      tpu.vector_store %arg7[%c0_23, %c0_24], %48 {strides = array<i32>} : memref<1x512xf32, #tpu.memory_space<vmem>>, vector<1x512xf32>,
    } else {
    }
    %c0 = arith.constant 0 : index
    %c0_1 = arith.constant 0 : index
    %3 = vector.load %arg2[%c0, %c0_1] : memref<4x512xf32, #tpu.memory_space<vmem>>, vector<4x512xf32>
    %c0_2 = arith.constant 0 : index
    %c0_3 = arith.constant 0 : index
    %4 = vector.load %arg3[%c0_2, %c0_3] : memref<1x512xi32, #tpu.memory_space<vmem>>, vector<1x512xi32>
    %c1_i32 = arith.constant 1 : i32
    %5 = arith.muli %arg0, %c1_i32 : i32
    %6 = arith.addi %5, %arg1 : i32
    %c512_i32 = arith.constant 512 : i32
    %7 = arith.muli %6, %c512_i32 : i32
    %8 = tpu.iota {dimensions = array<i32: 1>} : vector<1x512xi32>
    %9 = vector.broadcast %7 : i32 to vector<1x512xi32>
    %10 = arith.addi %9, %8 : vector<1x512xi32>
    %c512_i32_4 = arith.constant 512 : i32
    %11 = vector.broadcast %c512_i32_4 : i32 to vector<1x512xi32>
    %12 = arith.cmpi slt, %10, %11 : vector<1x512xi32>
    %c255_i32 = arith.constant 255 : i32
    %13 = vector.broadcast %c255_i32 : i32 to vector<1x512xi32>
    %14 = arith.cmpi ne, %4, %13 : vector<1x512xi32>
    %15 = arith.andi %12, %14 : vector<1x512xi1>
    %cst = arith.constant dense<0xFF800000> : vector<512xf32>
    %16 = vector.multi_reduction <maximumf>, %3, %cst [0] : vector<4x512xf32> to vector<512xf32>
    %17 = vector.shape_cast %16 : vector<512xf32> to vector<1x512xf32>
    %18 = vector.broadcast %17 : vector<1x512xf32> to vector<4x512xf32>
    %19 = arith.subf %3, %18 : vector<4x512xf32>
    %20 = math.exp %19 : vector<4x512xf32>
    %cst_5 = arith.constant dense<0.000000e+00> : vector<512xf32>
    %21 = vector.multi_reduction <add>, %20, %cst_5 [0] : vector<4x512xf32> to vector<512xf32>
    %22 = vector.shape_cast %21 : vector<512xf32> to vector<1x512xf32>
    %23 = math.log %22 : vector<1x512xf32>
    %24 = arith.addf %17, %23 : vector<1x512xf32>
    %25 = tpu.iota {dimensions = array<i32: 0>} : vector<4x512xi32>
    %26 = vector.broadcast %4 : vector<1x512xi32> to vector<4x512xi32>
    %27 = arith.cmpi eq, %25, %26 : vector<4x512xi32>
    %cst_6 = arith.constant 0.000000e+00 : f32
    %28 = vector.broadcast %cst_6 : f32 to vector<4x512xf32>
    %29 = arith.select %27, %3, %28 : vector<4x512xi1>, vector<4x512xf32>
    %cst_7 = arith.constant dense<0.000000e+00> : vector<512xf32>
    %30 = vector.multi_reduction <add>, %29, %cst_7 [0] : vector<4x512xf32> to vector<512xf32>
    %31 = vector.shape_cast %30 : vector<512xf32> to vector<1x512xf32>
    %32 = arith.subf %24, %31 : vector<1x512xf32>
    %cst_8 = arith.constant 0.000000e+00 : f32
    %33 = vector.broadcast %cst_8 : f32 to vector<1x512xf32>
    %34 = arith.select %15, %32, %33 : vector<1x512xi1>, vector<1x512xf32>
    %c0_9 = arith.constant 0 : index
    %c0_10 = arith.constant 0 : index
    %35 = vector.load %arg6[%c0_9, %c0_10] : memref<1x512xf32, #tpu.memory_space<vmem>>, vector<1x512xf32>
    %36 = arith.addf %35, %34 : vector<1x512xf32>
    %c0_11 = arith.constant 0 : index
    %c0_12 = arith.constant 0 : index
    %37 = vector.load %arg6[%c0_11, %c0_12] : memref<1x512xf32, #tpu.memory_space<vmem>>, vector<1x512xf32>
    tpu.vector_store %arg6[%c0_11, %c0_12], %36 {strides = array<i32>} : memref<1x512xf32, #tpu.memory_space<vmem>>, vector<1x512xf32>,
    %c0_13 = arith.constant 0 : index
    %c0_14 = arith.constant 0 : index
    %38 = vector.load %arg7[%c0_13, %c0_14] : memref<1x512xf32, #tpu.memory_space<vmem>>, vector<1x512xf32>
    %39 = arith.extui %15 : vector<1x512xi1> to vector<1x512xi32>
    %40 = arith.sitofp %39 : vector<1x512xi32> to vector<1x512xf32>
    %41 = arith.addf %38, %40 : vector<1x512xf32>
    %c0_15 = arith.constant 0 : index
    %c0_16 = arith.constant 0 : index
    %42 = vector.load %arg7[%c0_15, %c0_16] : memref<1x512xf32, #tpu.memory_space<vmem>>, vector<1x512xf32>
    tpu.vector_store %arg7[%c0_15, %c0_16], %41 {strides = array<i32>} : memref<1x512xf32, #tpu.memory_space<vmem>>, vector<1x512xf32>,
    %c0_i32_17 = arith.constant 0 : i32
    %43 = arith.cmpi eq, %arg1, %c0_i32_17 : i32
    %44 = arith.extui %43 : i1 to i32
    %c0_i32_18 = arith.constant 0 : i32
    %45 = arith.cmpi ne, %44, %c0_i32_18 : i32
    scf.if %45 {
      %c0_19 = arith.constant 0 : index
      %c0_20 = arith.constant 0 : index
      %46 = vector.load %arg6[%c0_19, %c0_20] : memref<1x512xf32, #tpu.memory_space<vmem>>, vector<1x512xf32>
      %cst_21 = arith.constant dense<0.000000e+00> : vector<1xf32>
      %47 = vector.multi_reduction <add>, %46, %cst_21 [1] : vector<1x512xf32> to vector<1xf32>
      %48 = vector.shape_cast %47 : vector<1xf32> to vector<1x1xf32>
      %49 = vector.shape_cast %48 : vector<1x1xf32> to vector<1x1x1xf32>
      %c0_22 = arith.constant 0 : index
      %c0_23 = arith.constant 0 : index
      %c0_24 = arith.constant 0 : index
      %50 = vector.load %arg4[%c0_22, %c0_23, %c0_24] : memref<1x1x1xf32, #tpu.memory_space<vmem>>, vector<1x1x1xf32>
      tpu.vector_store %arg4[%c0_22, %c0_23, %c0_24], %49 {strides = array<i32>} : memref<1x1x1xf32, #tpu.memory_space<vmem>>, vector<1x1x1xf32>,
      %c0_25 = arith.constant 0 : index
      %c0_26 = arith.constant 0 : index
      %51 = vector.load %arg7[%c0_25, %c0_26] : memref<1x512xf32, #tpu.memory_space<vmem>>, vector<1x512xf32>
      %cst_27 = arith.constant dense<0.000000e+00> : vector<1xf32>
      %52 = vector.multi_reduction <add>, %51, %cst_27 [1] : vector<1x512xf32> to vector<1xf32>
      %53 = vector.shape_cast %52 : vector<1xf32> to vector<1x1xf32>
      %54 = vector.shape_cast %53 : vector<1x1xf32> to vector<1x1x1xf32>
      %c0_28 = arith.constant 0 : index
      %c0_29 = arith.constant 0 : index
      %c0_30 = arith.constant 0 : index
      %55 = vector.load %arg5[%c0_28, %c0_29, %c0_30] : memref<1x1x1xf32, #tpu.memory_space<vmem>>, vector<1x1x1xf32>
      tpu.vector_store %arg5[%c0_28, %c0_29, %c0_30], %54 {strides = array<i32>} : memref<1x1x1xf32, #tpu.memory_space<vmem>>, vector<1x1x1xf32>,
    } else {
    }
    return
  }
  func.func @transform_0(%arg0: i32, %arg1: i32) -> (i32, i32) {
    %c1_i32 = arith.constant 1 : i32
    %0 = arith.muli %arg0, %c1_i32 : i32
    %1 = arith.addi %0, %arg1 : i32
    %c0_i32 = arith.constant 0 : i32
    %2 = arith.minsi %1, %c0_i32 : i32
    %c0_i32_0 = arith.constant 0 : i32
    %c0_i32_1 = arith.constant 0 : i32
    return %c0_i32_0, %2 : i32, i32
  }
  func.func @transform_1(%arg0: i32, %arg1: i32) -> (i32, i32) {
    %c1_i32 = arith.constant 1 : i32
    %0 = arith.muli %arg0, %c1_i32 : i32
    %1 = arith.addi %0, %arg1 : i32
    %c0_i32 = arith.constant 0 : i32
    %2 = arith.minsi %1, %c0_i32 : i32
    %c0_i32_0 = arith.constant 0 : i32
    %c0_i32_1 = arith.constant 0 : i32
    return %c0_i32_0, %2 : i32, i32
  }
  func.func @transform_2(%arg0: i32, %arg1: i32) -> (i32, i32, i32) {
    %c0_i32 = arith.constant 0 : i32
    %c0_i32_0 = arith.constant 0 : i32
    %c0_i32_1 = arith.constant 0 : i32
    return %arg0, %c0_i32, %c0_i32_0 : i32, i32, i32
  }
  func.func @transform_3(%arg0: i32, %arg1: i32) -> (i32, i32, i32) {
    %c0_i32 = arith.constant 0 : i32
    %c0_i32_0 = arith.constant 0 : i32
    %c0_i32_1 = arith.constant 0 : i32
    return %arg0, %c0_i32, %c0_i32_0 : i32, i32, i32
  }
}

</mosaic_0001>

<bundles_post_ra>
// kernel: cross_entropy_2d.1
= control target key start
LH: loop header
LB: loop body
LE: loop exit
PB: predicated region body
PF: predicated region fallthrough
CT: control target
= control target key end

     0   :  { %9 = vsyncpa [#allocation5], 0  ;;  %v80_v0 = vlaneseq  ;;  %s660_s0 = inlined_call_operand.vmem [shape: f32[4,512], index: 0, kind: input, shape index: {}]   ;;  %s661_s1 = inlined_call_operand.vmem [shape: s32[1,512], index: 1, kind: input, shape index: {}]   ;;  %s662_s2 = inlined_call_operand.hbm [shape: f32[1,1,1], index: 2, kind: output, shape index: {0}]   ;;  %s663_s3 = inlined_call_operand.hbm [shape: f32[1,1,1], index: 3, kind: output, shape index: {1}]  }
   0x1   :  { %v518_v1 = vld [vmem:[%s660_s0] sm:$0xff]  ;;  %v523_v2 = vld [vmem:[%s660_s0 + $0x8] sm:$0xff] }
   0x2   :  { %121 = vst [vmem:[#allocation1] ss:$2 sm:$0xff] %v518_v1 }
   0x3   :  { %10 = vsyncpa [#allocation7], 0  ;;  %vm527_vm0 = vcmp.lt.s32.totalorder %v80_v0, 512  ;;  %123 = vst [vmem:[#allocation1 + $0x10] ss:$2 sm:$0xff] %v523_v2  ;;  %v491_v4 = vmov 0.0  }
   0x4   :  { %84 = vst.msk [vmem:[#allocation2] sm:$0xf] %vm527_vm0, %v491_v4  ;;  %vm132_vm1 = vcmask 1043456   ;;  %v88_v45 = vld [vmem:[%s661_s1] sm:$0xf]  ;;  %v492_v48 = vmov 0  }
   0x5   :  { %85 = vst.msk [vmem:[#allocation3] sm:$0xf] %vm527_vm0, %v491_v4  ;;  %vm105_vm2 = vcmp.ne.s32.totalorder %v88_v45, 255  ;;  %v231_v54 = vshrl.u32 %v80_v0, 7  ;;  %v233_v55 = vperm.slane %v88_v45, 1  ;;  %v234_v56 = vperm.slane %v88_v45, 2 }
   0x6   :  { %v106_v49 = vsel %vm105_vm2, 1, %v492_v48  ;;  %v235_v57 = vperm.slane %v88_v45, 3  ;;  %vm299_vm11 = vcmask 1040384   ;;  %vm301_vm12 = vcmask 1042434   ;;  %s493_s1 = smov [#allocation4]   ;;  %s385_s20 = sshll.u32 %s662_s2, 4  ;;  %s386_s20 = int_to_ptr.hbm [resolvable:$true] %s385_s20 }
   0x7   :  { %v107_v50 = vperm.slane %v106_v49, 0  ;;  %v108_v51 = vperm.slane %v106_v49, 1  ;;  %v109_v52 = vperm.slane %v106_v49, 2  ;;  %v110_v53 = vperm.slane %v106_v49, 3  ;;  %s383_s17 = sshll.u32 %s493_s1, 4  ;;  %s494_s21 = smov [#allocation6]   ;;  %s384_s17 = int_to_ptr.vmem [resolvable:$true] %s383_s17 }
   0x8   :  { %vm580_vm6 = vcmp.eq.s32.totalorder %v231_v54, %v233_v55  ;;  %vm584_vm7 = vcmp.eq.s32.totalorder %v231_v54, %v234_v56  ;;  %vm588_vm8 = vcmp.eq.s32.totalorder %v231_v54, %v235_v57  ;;  %vm303_vm13 = vcmask 1041408   ;;  %s394_s22 = sshll.u32 %s494_s21, 4  ;;  %s396_s25 = sshll.u32 %s663_s3, 4  ;;  %s395_s22 = int_to_ptr.vmem [resolvable:$true] %s394_s22  ;;  %s397_s25 = int_to_ptr.hbm [resolvable:$true] %s396_s25 }
   0x9   :  { %v124_v5 = vld.sshfl [vmem:[#allocation1] sm:$0xff pattern:$0x75316420]  ;;  %v125_v6 = vld.sshfl [vmem:[#allocation1 + $0x8] sm:$0xff pattern:$0x75316420] }
   0xa   :  { %v126_v7 = vld.sshfl [vmem:[#allocation1 + $0x10] sm:$0xff pattern:$0x75316420]  ;;  %v127_v8 = vld.sshfl [vmem:[#allocation1 + $0x18] sm:$0xff pattern:$0x75316420] }
   0xb   :  { %v133_v9 = vsel %vm132_vm1, %v124_v5, -inf  ;;  %v140_v10 = vsel %vm132_vm1, %v125_v6, -inf  ;;  %v147_v11 = vsel %vm132_vm1, %v126_v7, -inf  ;;  %v154_v12 = vsel %vm132_vm1, %v127_v8, -inf }
   0xc   :  { %v134_v13 = vrot.slane %v133_v9, 4  ;;  %v141_v14 = vrot.slane %v140_v10, 4  ;;  %v148_v15 = vrot.slane %v147_v11, 4  ;;  %v155_v16 = vrot.slane %v154_v12, 4 }
   0xd   :  { %vm568_vm3 = vcmp.ne.s32.totalorder %v108_v51, 0  ;;  %vm572_vm4 = vcmp.ne.s32.totalorder %v109_v52, 0  ;;  %vm576_vm5 = vcmp.ne.s32.totalorder %v110_v53, 0  ;;  %vm592_vm9 = vcmp.ne.s32.totalorder %v107_v50, 0 }
   0xe   :  { %v135_v17 = vmax.f32 %v133_v9, %v134_v13  ;;  %v142_v18 = vmax.f32 %v140_v10, %v141_v14  ;;  %v149_v19 = vmax.f32 %v147_v11, %v148_v15  ;;  %v156_v20 = vmax.f32 %v154_v12, %v155_v16 }
   0xf   :  { %v232_v12 = vperm.slane %v88_v45, 0  ;;  %vm356_vm14 = vcmask 0  }
  0x10   :  { %v136_v21 = vrot.slane %v135_v17, 2  ;;  %v143_v22 = vrot.slane %v142_v18, 2  ;;  %v150_v23 = vrot.slane %v149_v19, 2  ;;  %v157_v24 = vrot.slane %v156_v20, 2 }
  0x11   :  { %vm596_vm10 = vcmp.eq.s32.totalorder %v231_v54, %v232_v12 }
  0x12   :  { %v137_v25 = vmax.f32 %v135_v17, %v136_v21  ;;  %v144_v26 = vmax.f32 %v142_v18, %v143_v22  ;;  %v151_v27 = vmax.f32 %v149_v19, %v150_v23  ;;  %v158_v28 = vmax.f32 %v156_v20, %v157_v24 }
  0x14   :  { %v138_v29 = vrot.slane %v137_v25, 1  ;;  %v145_v30 = vrot.slane %v144_v26, 1  ;;  %v152_v31 = vrot.slane %v151_v27, 1  ;;  %v159_v32 = vrot.slane %v158_v28, 1 }
  0x16   :  { %v542_v33 = vmax.f32 %v137_v25, %v138_v29  ;;  %v544_v34 = vmax.f32 %v144_v26, %v145_v30  ;;  %v546_v35 = vmax.f32 %v151_v27, %v152_v31  ;;  %v548_v36 = vmax.f32 %v158_v28, %v159_v32 }
  0x17   :  { %v420_v25 = vsel %vm568_vm3, 1.0, %v491_v4  ;;  %v421_v26 = vsel %vm572_vm4, 1.0, %v491_v4  ;;  %v422_v27 = vsel %vm576_vm5, 1.0, %v491_v4 }
  0x18   :  { %v165_v37 = vrot.slane %v544_v34, 4  ;;  %v166_v38 = vrot.slane %v548_v36, 4 }
  0x1a   :  { %v167_v39 = vsel %vm132_vm1, %v542_v33, %v165_v37  ;;  %v168_v40 = vsel %vm132_vm1, %v546_v35, %v166_v38 }
  0x1b   :  { %v171_v41 = vsub.f32 %v518_v1, %v167_v39  ;;  %v172_v42 = vsub.f32 %v523_v2, %v168_v40 }
  0x1d   :  { %v173_v43 = vmul.f32 1.442695, %v171_v41  ;;  %v175_v44 = vmul.f32 1.442695, %v172_v42 }
  0x1f   :  { %427 = vpow2.f32 %v173_v43 }
  0x20   :  { %429 = vpow2.f32 %v175_v44 }
  0x25   :  { %v428_v46 = vpop.eup %427 }
  0x26   :  { %v430_v47 = vpop.eup %429  ;;  %179 = vst [vmem:[#allocation1] ss:$2 sm:$0xff] %v428_v46 }
  0x27   :  { %181 = vst [vmem:[#allocation1 + $0x10] ss:$2 sm:$0xff] %v430_v47 }
  0x2d   :  { %v182_v58 = vld.sshfl [vmem:[#allocation1] sm:$0xff pattern:$0x75316420]  ;;  %v183_v59 = vld.sshfl [vmem:[#allocation1 + $0x8] sm:$0xff pattern:$0x75316420] }
  0x2e   :  { %v184_v60 = vld.sshfl [vmem:[#allocation1 + $0x10] sm:$0xff pattern:$0x75316420]  ;;  %v185_v61 = vld.sshfl [vmem:[#allocation1 + $0x18] sm:$0xff pattern:$0x75316420] }
  0x2f   :  { %v190_v62 = vsel %vm132_vm1, %v182_v58, 0.0  ;;  %v197_v63 = vsel %vm132_vm1, %v183_v59, 0.0  ;;  %v204_v5 = vsel %vm132_vm1, %v184_v60, 0.0  ;;  %v211_v6 = vsel %vm132_vm1, %v185_v61, 0.0  ;;  %240 = vst [vmem:[#allocation1] ss:$2 sm:$0xff] %v518_v1 }
  0x30   :  { %v191_v7 = vrot.slane %v190_v62, 4  ;;  %v198_v8 = vrot.slane %v197_v63, 4  ;;  %v205_v0 = vrot.slane %v204_v5, 4  ;;  %v212_v9 = vrot.slane %v211_v6, 4  ;;  %242 = vst [vmem:[#allocation1 + $0x10] ss:$2 sm:$0xff] %v523_v2 }
  0x31   :  { %v419_v60 = vsel %vm592_vm9, 1.0, %v491_v4  ;;  %v325_v61 = vrot.slane %v420_v25, 7 }
  0x32   :  { %v192_v13 = vadd.f32 %v191_v7, %v190_v62  ;;  %v199_v14 = vadd.f32 %v198_v8, %v197_v63  ;;  %v206_v15 = vadd.f32 %v205_v0, %v204_v5  ;;  %v213_v16 = vadd.f32 %v212_v9, %v211_v6 }
  0x33   :  { %v326_v7 = vrot.slane %v421_v26, 6  ;;  %v327_v8 = vrot.slane %v422_v27, 5 }
  0x34   :  { %v193_v20 = vrot.slane %v192_v13, 2  ;;  %v200_v21 = vrot.slane %v199_v14, 2  ;;  %v207_v22 = vrot.slane %v206_v15, 2  ;;  %v214_v23 = vrot.slane %v213_v16, 2 }
  0x36   :  { %v194_v28 = vadd.f32 %v193_v20, %v192_v13  ;;  %v201_v29 = vadd.f32 %v200_v21, %v199_v14  ;;  %v208_v30 = vadd.f32 %v207_v22, %v206_v15  ;;  %v215_v31 = vadd.f32 %v214_v23, %v213_v16  ;;  %v243_v32 = vld.sshfl [vmem:[#allocation1] sm:$0xff pattern:$0x75316420]  ;;  %v244_v37 = vld.sshfl [vmem:[#allocation1 + $0x8] sm:$0xff pattern:$0x75316420] }
  0x37   :  { %v245_v38 = vld.sshfl [vmem:[#allocation1 + $0x10] sm:$0xff pattern:$0x75316420]  ;;  %v246_v39 = vld.sshfl [vmem:[#allocation1 + $0x18] sm:$0xff pattern:$0x75316420]  ;;  %v328_v14 = vsel %vm299_vm11, %v419_v60, %v325_v61  ;;  %v329_v16 = vsel %vm301_vm12, %v326_v7, %v327_v8 }
  0x38   :  { %v195_v40 = vrot.slane %v194_v28, 1  ;;  %v202_v41 = vrot.slane %v201_v29, 1  ;;  %v209_v42 = vrot.slane %v208_v30, 1  ;;  %v216_v43 = vrot.slane %v215_v31, 1  ;;  %v312_v13 = vld [vmem:[#allocation3] sm:$0xf] }
  0x39   :  { %v251_v44 = vsel %vm596_vm10, %v243_v32, 0.0  ;;  %v252_v45 = vsel %vm580_vm6, %v244_v37, 0.0  ;;  %v253_v46 = vsel %vm584_vm7, %v245_v38, 0.0  ;;  %v254_v47 = vsel %vm588_vm8, %v246_v39, 0.0 }
  0x3a   :  { %v196_v48 = vadd.f32 %v195_v40, %v194_v28  ;;  %v203_v49 = vadd.f32 %v202_v41, %v201_v29  ;;  %v210_v50 = vadd.f32 %v209_v42, %v208_v30  ;;  %v217_v51 = vadd.f32 %v216_v43, %v215_v31 }
  0x3b   :  { %v255_v52 = vsel %vm132_vm1, %v251_v44, 0.0  ;;  %v262_v53 = vsel %vm132_vm1, %v252_v45, 0.0  ;;  %v269_v54 = vsel %vm132_vm1, %v253_v46, 0.0  ;;  %v276_v55 = vsel %vm132_vm1, %v254_v47, 0.0 }
  0x3c   :  { %431 = vlog2.f32 %v196_v48  ;;  %v256_v56 = vrot.slane %v255_v52, 4  ;;  %v263_v57 = vrot.slane %v262_v53, 4  ;;  %v270_v58 = vrot.slane %v269_v54, 4 }
  0x3d   :  { %433 = vlog2.f32 %v203_v49  ;;  %v277_v59 = vrot.slane %v276_v55, 4  ;;  %v330_v20 = vsel %vm303_vm13, %v328_v14, %v329_v16 }
  0x3e   :  { %435 = vlog2.f32 %v210_v50  ;;  %v257_v62 = vadd.f32 %v256_v56, %v255_v52  ;;  %v264_v63 = vadd.f32 %v263_v57, %v262_v53  ;;  %v271_v5 = vadd.f32 %v270_v58, %v269_v54  ;;  %v291_v54 = vld [vmem:[#allocation2] sm:$0xf] }
  0x3f   :  { %437 = vlog2.f32 %v217_v51  ;;  %v278_v6 = vadd.f32 %v277_v59, %v276_v55  ;;  %v332_v24 = vadd.f32 %v330_v20, %v312_v13 }
  0x40   :  { %v258_v0 = vrot.slane %v257_v62, 2  ;;  %v265_v9 = vrot.slane %v264_v63, 2  ;;  %v272_v12 = vrot.slane %v271_v5, 2 }
  0x41   :  { %v279_v15 = vrot.slane %v278_v6, 2  ;;  %333 = vst.msk [vmem:[#allocation3] sm:$0xf] %vm527_vm0, %v332_v24 }
  0x42   :  { %v432_v4 = vpop.eup %431  ;;  %v259_v17 = vadd.f32 %v258_v0, %v257_v62  ;;  %v266_v2 = vadd.f32 %v265_v9, %v264_v63  ;;  %v273_v18 = vadd.f32 %v272_v12, %v271_v5 }
  0x43   :  { %v434_v21 = vpop.eup %433  ;;  %v219_v22 = vmul.f32 0.6931472, %v432_v4  ;;  %v280_v23 = vadd.f32 %v279_v15, %v278_v6 }
  0x44   :  { %v436_v25 = vpop.eup %435  ;;  %v221_v26 = vmul.f32 0.6931472, %v434_v21  ;;  %v260_v27 = vrot.slane %v259_v17, 1  ;;  %v267_v28 = vrot.slane %v266_v2, 1  ;;  %v274_v29 = vrot.slane %v273_v18, 1 }
  0x45   :  { %v438_v30 = vpop.eup %437  ;;  %v223_v31 = vmul.f32 0.6931472, %v436_v25  ;;  %v226_v32 = vadd.f32 %v219_v22, %v542_v33  ;;  %v281_v37 = vrot.slane %v280_v23, 1 }
  0x46   :  { %v225_v38 = vmul.f32 0.6931472, %v438_v30  ;;  %v227_v39 = vadd.f32 %v221_v26, %v544_v34  ;;  %v261_v40 = vadd.f32 %v260_v27, %v259_v17  ;;  %v268_v41 = vadd.f32 %v267_v28, %v266_v2 }
  0x47   :  { %v228_v42 = vadd.f32 %v223_v31, %v546_v35  ;;  %v275_v43 = vadd.f32 %v274_v29, %v273_v18  ;;  %v282_v44 = vadd.f32 %v281_v37, %v280_v23 }
  0x48   :  { %v229_v45 = vadd.f32 %v225_v38, %v548_v36  ;;  %v283_v46 = vsub.f32 %v226_v32, %v261_v40  ;;  %v284_v47 = vsub.f32 %v227_v39, %v268_v41  ;;  %v358_v10 = vld [vmem:[#allocation3] sm:$0xf] }
  0x49   :  { %v285_v48 = vsub.f32 %v228_v42, %v275_v43  ;;  %v360_v11 = vperm.slane %v358_v10, 0  ;;  %v361_v57 = vperm.slane %v358_v10, 1  ;;  %v362_v62 = vperm.slane %v358_v10, 2 }
  0x4a   :  { %v286_v49 = vsub.f32 %v229_v45, %v282_v44  ;;  %v287_v33 = vsel %vm592_vm9, %v283_v46, 0.0  ;;  %v288_v50 = vsel %vm568_vm3, %v284_v47, 0.0  ;;  %v363_v13 = vperm.slane %v358_v10, 3 }
  0x4b   :  { %v289_v34 = vsel %vm572_vm4, %v285_v48, 0.0  ;;  %v296_v51 = vrot.slane %v288_v50, 7  ;;  %v368_v63 = vsel %vm299_vm11, %v360_v11, 0.0  ;;  %v369_v3 = vsel %vm299_vm11, %v361_v57, 0.0 }
  0x4c   :  { %v290_v35 = vsel %vm576_vm5, %v286_v49, 0.0  ;;  %v297_v52 = vrot.slane %v289_v34, 6  ;;  %v370_v12 = vadd.f32 %v369_v3, %v368_v63  ;;  %v371_v14 = vsel %vm299_vm11, %v362_v62, 0.0 }
  0x4d   :  { %v298_v53 = vrot.slane %v290_v35, 5  ;;  %v300_v36 = vsel %vm299_vm11, %v287_v33, %v296_v51  ;;  %v373_v4 = vsel %vm299_vm11, %v363_v13, 0.0 }
  0x4e   :  { %v372_v16 = vadd.f32 %v371_v14, %v370_v12 }
  0x4f   :  { %v302_v55 = vsel %vm301_vm12, %v297_v52, %v298_v53 }
  0x50   :  { %v304_v19 = vsel %vm303_vm13, %v300_v36, %v302_v55  ;;  %v374_v17 = vadd.f32 %v373_v4, %v372_v16 }
  0x51   :  { %v306_v56 = vadd.f32 %v304_v19, %v291_v54 }
  0x53   :  { %311 = vst.msk [vmem:[#allocation2] sm:$0xf] %vm527_vm0, %v306_v56 }
  0x5a   :  { %v337_v58 = vld [vmem:[#allocation2] sm:$0xf] }
  0x5b   :  { %v339_v59 = vperm.slane %v337_v58, 0  ;;  %v340_v1 = vperm.slane %v337_v58, 1  ;;  %v341_v60 = vperm.slane %v337_v58, 2  ;;  %v342_v61 = vperm.slane %v337_v58, 3 }
  0x5d   :  { %v347_v5 = vsel %vm299_vm11, %v339_v59, 0.0  ;;  %v348_v6 = vsel %vm299_vm11, %v340_v1, 0.0  ;;  %v350_v7 = vsel %vm299_vm11, %v341_v60, 0.0  ;;  %v352_v0 = vsel %vm299_vm11, %v342_v61, 0.0 }
  0x5e   :  { %v349_v8 = vadd.f32 %v348_v6, %v347_v5 }
  0x60   :  { %v351_v9 = vadd.f32 %v350_v7, %v349_v8 }
  0x62   :  { %v353_v15 = vadd.f32 %v352_v0, %v351_v9 }
  0x64   :  { %354 = vadd.xlane.f32.xlu0 %v353_v15 }
  0x6c   :  { %375 = vadd.xlane.f32.xlu0 %v374_v17 }
  0xd7   :  { %v355_v2 = vpop.xlane.xlu0 %354 }
  0xd8   :  { %357 = vst.msk [vmem:[#allocation4] sm:$0x1] %vm356_vm14, %v355_v2 }
  0xd9   :  { %388 = dma.vmem_to_hbm [thread:$0]  %s384_s17, 16, %s386_s20, [#allocation5]  }
  0xdf   :  { %v376_v18 = vpop.xlane.xlu0 %375 }
  0xe0   :  { %377 = vst.msk [vmem:[#allocation6] sm:$0x1] %vm356_vm14, %v376_v18 }
  0xe1   :  { %399 = dma.vmem_to_hbm [thread:$0]  %s395_s22, 16, %s397_s25, [#allocation7]  }
  0xe2   :  { %487 = dma.done.wait [#allocation5], 16  }
  0xe3   :  { %488 = vsyncadd [#allocation5], 4294967280 }
  0xe4   :  { %489 = dma.done.wait [#allocation7], 16  }
  0xe5   :  { %490 = vsyncadd [#allocation7], 4294967280 }
  0xe6   :  { %408 = vsyncpa [#allocation5], 1 }
  0xe7   :  { %409 = vsyncpa [#allocation7], 1 }

</bundles_post_ra>
